<compile_context>
chip_gen: v5e
topology: v5e:2x2
jax: 0.10.0
libtpu: 0.0.40
codegen_flags: <defaults>
</compile_context>

<pallas_src>
import jax
import jax.numpy as jnp
from jax.experimental import pallas as pl
from jax.experimental.pallas import tpu as pltpu


def _unit_dropout_kernel(mask_ref, x_ref, o_ref):
    # mask_ref: (TB, D) keep-mask with 1/(1-p) already folded in.
    # x_ref / o_ref: (TB, TU, D) tiles.
    m = mask_ref[...]
    o_ref[...] = (x_ref[...] * m[:, None, :]).astype(o_ref.dtype)


def _round_down_mult(x, m):
    return max(m, (x // m) * m)


def unit_dropout(x, dropout, seed, *, training=True, donate_x=False):
    """x: [batch, num_unit, unit_dim]. Returns same shape/dtype."""
    assert x.ndim == 3
    dropout = float(dropout)
    assert 0.0 <= dropout < 1.0, "dropout must be in [0, 1)"
    if not training or dropout == 0.0:
        return x

    batch, num_unit, unit_dim = x.shape
    scale = 1.0 / (1.0 - dropout)
    itemsize = jnp.dtype(x.dtype).itemsize

    # ---- per-(batch, unit_dim) keep-mask, shared across num_unit, pre-scaled.
    # TODO(synk): not bit-identical to torch.rand for the same seed (different
    # RNG stream); distributionally equivalent only.
    key = jax.random.PRNGKey(seed)
    u = jax.random.uniform(key, (batch, unit_dim), dtype=jnp.float32)
    mask = jnp.where(u >= dropout, jnp.float32(scale), jnp.float32(0.0))
    if x.dtype in (jnp.bfloat16, jnp.float16):
        # Keep the multiply in the packed dtype on bf16-VALU chips (v6e/v7x);
        # on v5e it upcasts anyway so this is at worst neutral.
        mask = mask.astype(x.dtype)

    # ---- lane-density folding: make the last block dim a multiple of 128.
    k = 1
    if unit_dim % 128 != 0:
        for cand in range(2, min(num_unit, 128) + 1):
            if num_unit % cand == 0 and (cand * unit_dim) % 128 == 0:
                k = cand
                break
    num_fold = num_unit // k
    d_lane = k * unit_dim
    if k > 1:
        x_work = x.reshape(batch, num_fold, d_lane)
        mask_work = jnp.tile(mask, (1, k))          # same mask for each folded unit
    else:
        x_work = x
        mask_work = mask

    # ---- tile-size selection: big tiles for this HBM-bound elementwise op,
    # sized by the chip's VMEM capacity.
    try:
        vmem_cap = int(pltpu.get_tpu_info().vmem_capacity_bytes)
    except Exception:
        vmem_cap = 64 * 1024 * 1024                 # conservative (v7x-sized)
    if vmem_cap >= 100 * 1024 * 1024:               # v5e / v6e (128 MiB VMEM)
        target_tile_bytes = 6 * 1024 * 1024
    else:                                           # v7x (64 MiB VMEM per TC)
        target_tile_bytes = 3 * 1024 * 1024

    tb = min(batch, 8)
    sub_mult = max(8, 32 // itemsize)               # 8 f32 / 16 bf16 / 32 int8
    target_elems = max(1, target_tile_bytes // itemsize)
    tu_cap = max(1, target_elems // max(1, tb * d_lane))
    if num_fold <= tu_cap:
        tu = num_fold                               # full axis: always legal
    else:
        tu = _round_down_mult(min(tu_cap, num_fold), sub_mult)

    # Ensure >= 2 grid blocks for mid/large inputs so v7x megacore can shard.
    total_bytes = batch * num_unit * unit_dim * itemsize
    if (pl.cdiv(batch, tb) * pl.cdiv(num_fold, tu) == 1
            and total_bytes > (1 << 20)
            and num_fold >= 2 * sub_mult):
        tu = _round_down_mult(pl.cdiv(num_fold, 2), sub_mult)

    grid = (pl.cdiv(batch, tb), pl.cdiv(num_fold, tu))

    # ---- VMEM limit sized from actual double-buffered usage (+ headroom).
    x_tile_bytes = tb * tu * d_lane * itemsize
    mask_tile_bytes = tb * d_lane * jnp.dtype(mask_work.dtype).itemsize
    vmem_need = 4 * x_tile_bytes + 2 * mask_tile_bytes + (4 << 20)
    vmem_limit = int(min(max(vmem_need, 16 << 20), 48 << 20))

    out = pl.pallas_call(
        _unit_dropout_kernel,
        out_shape=jax.ShapeDtypeStruct((batch, num_fold, d_lane), x.dtype),
        grid=grid,
        in_specs=[
            # mask block depends only on the batch block -> re-fetch skipped
            # across consecutive unit-block steps.
            pl.BlockSpec((tb, d_lane), lambda bi, ui: (bi, 0)),
            pl.BlockSpec((tb, tu, d_lane), lambda bi, ui: (bi, ui, 0)),
        ],
        out_specs=pl.BlockSpec((tb, tu, d_lane), lambda bi, ui: (bi, ui, 0)),
        compiler_params=pltpu.CompilerParams(
            dimension_semantics=("parallel", "parallel"),
            vmem_limit_bytes=vmem_limit,
        ),
        input_output_aliases=({1: 0} if donate_x else {}),
    )(mask_work, x_work)

    if k > 1:
        out = out.reshape(batch, num_unit, unit_dim)
    return out


if __name__ == "__main__":
    key = jax.random.PRNGKey(0)
    batch, num_unit, unit_dim = 2, 8, 32
    dropout = 0.25

    x = jax.random.normal(key, (batch, num_unit, unit_dim), dtype=jnp.float32)

    # Training mode: mask + rescale.
    y = unit_dropout(x, dropout, seed=1234, training=True)
    y = jax.block_until_ready(y)

    assert y.shape == x.shape and y.dtype == x.dtype
    scale = 1.0 / (1.0 - dropout)
    # The mask must be shared across the num_unit axis: every (batch, unit_dim)
    # column is either entirely zeroed or entirely equal to x * scale.
    col_zero = jnp.all(y == 0.0, axis=1)                                   # (batch, unit_dim)
    col_kept = jnp.all(
        jnp.abs(y - x * scale) <= 1e-5 * (1.0 + jnp.abs(x) * scale), axis=1
    )                                                                      # (batch, unit_dim)
    assert bool(jnp.all(col_zero | col_kept)), "mask not shared across units"

    # Eval mode: identity.
    y_eval = unit_dropout(x, dropout, seed=1234, training=False)
    y_eval = jax.block_until_ready(y_eval)
    assert bool(jnp.all(y_eval == x))

    print("KERNEL_OK")
</pallas_src>

<mosaic_0001>
module attributes {stable_mosaic.version = 11 : i64} {
  func.func @_unit_dropout_kernel(%arg0: i32, %arg1: i32, %arg2: memref<2x128xf32, #tpu.memory_space<vmem>>, %arg3: memref<2x2x128xf32, #tpu.memory_space<vmem>>, %arg4: memref<2x2x128xf32, #tpu.memory_space<vmem>>) attributes {dimension_semantics = [#tpu.dimension_semantics<parallel>, #tpu.dimension_semantics<parallel>], iteration_bounds = array<i64: 1, 1>, scalar_prefetch = 0 : i64, scratch_operands = 0 : i64, tpu.core_type = #tpu.core_type<tc>, window_params = [{transform_indices = @transform_0, window_bounds = array<i64: 2, 128>}, {transform_indices = @transform_1, window_bounds = array<i64: 2, 2, 128>}, {transform_indices = @transform_2, window_bounds = array<i64: 2, 2, 128>}]} {
    %c0 = arith.constant 0 : index
    %c0_0 = arith.constant 0 : index
    %0 = vector.load %arg2[%c0, %c0_0] : memref<2x128xf32, #tpu.memory_space<vmem>>, vector<2x128xf32>
    %c0_1 = arith.constant 0 : index
    %c0_2 = arith.constant 0 : index
    %c0_3 = arith.constant 0 : index
    %1 = vector.load %arg3[%c0_1, %c0_2, %c0_3] : memref<2x2x128xf32, #tpu.memory_space<vmem>>, vector<2x2x128xf32>
    %2 = vector.shape_cast %0 : vector<2x128xf32> to vector<2x1x128xf32>
    %3 = vector.broadcast %2 : vector<2x1x128xf32> to vector<2x2x128xf32>
    %4 = arith.mulf %1, %3 : vector<2x2x128xf32>
    %c0_4 = arith.constant 0 : index
    %c0_5 = arith.constant 0 : index
    %c0_6 = arith.constant 0 : index
    %5 = vector.load %arg4[%c0_4, %c0_5, %c0_6] : memref<2x2x128xf32, #tpu.memory_space<vmem>>, vector<2x2x128xf32>
    tpu.vector_store %arg4[%c0_4, %c0_5, %c0_6], %4 {strides = array<i32>} : memref<2x2x128xf32, #tpu.memory_space<vmem>>, vector<2x2x128xf32>,
    return
  }
  func.func @transform_0(%arg0: i32, %arg1: i32) -> (i32, i32) {
    %c0_i32 = arith.constant 0 : i32
    %c0_i32_0 = arith.constant 0 : i32
    return %arg0, %c0_i32 : i32, i32
  }
  func.func @transform_1(%arg0: i32, %arg1: i32) -> (i32, i32, i32) {
    %c0_i32 = arith.constant 0 : i32
    %c0_i32_0 = arith.constant 0 : i32
    return %arg0, %arg1, %c0_i32 : i32, i32, i32
  }
  func.func @transform_2(%arg0: i32, %arg1: i32) -> (i32, i32, i32) {
    %c0_i32 = arith.constant 0 : i32
    %c0_i32_0 = arith.constant 0 : i32
    return %arg0, %arg1, %c0_i32 : i32, i32, i32
  }
}

</mosaic_0001>

<bundles_post_ra>
// kernel: tpu_custom_call.1
= control target key start
LH: loop header
LB: loop body
LE: loop exit
PB: predicated region body
PF: predicated region fallthrough
CT: control target
= control target key end

     0   :  { %7 = vsyncpa [#allocation3], 0  ;;  %s187_s0 = inlined_call_operand.hbm [shape: f32[2,128], index: 0, kind: input, shape index: {}]   ;;  %s188_s1 = inlined_call_operand.hbm [shape: f32[2,2,128], index: 1, kind: input, shape index: {}]   ;;  %s189_s2 = inlined_call_operand.hbm [shape: f32[2,2,128], index: 2, kind: output, shape index: {}]  }
   0x1   :  { %8 = vsyncpa [#allocation6], 0 }
   0x2   :  { %9 = vsyncpa [#allocation4], 0  ;;  %s15_s11 = sshll.u32 %s187_s0, 4  ;;  %s158_s12 = smov [#allocation2]   ;;  %s16_s11 = int_to_ptr.hbm [resolvable:$true] %s15_s11 }
   0x3   :  { %s17_s13 = sshll.u32 %s158_s12, 4  ;;  %s25_s16 = sshll.u32 %s188_s1, 4  ;;  %s18_s13 = int_to_ptr.vmem [resolvable:$true] %s17_s13  ;;  %s26_s16 = int_to_ptr.hbm [resolvable:$true] %s25_s16 }
   0x4   :  { %20 = dma.hbm_to_vmem [thread:$0]  %s16_s11, 32, %s18_s13, [#allocation3]  }
   0x5   :  { %s159_s17 = smov [#allocation5]   ;;  %s160_s19 = smov 32  }
   0x6   :  { %s27_s18 = sshll.u32 %s159_s17, 4  ;;  %s161_s20 = smov 2   ;;  %s28_s18 = int_to_ptr.vmem [resolvable:$true] %s27_s18 }
   0x7   :  { %33 = dma.hbm_to_vmem [thread:$0]  %s26_s16, 64, %s28_s18, [#allocation6], %s160_s19, %s160_s19, %s161_s20  }
   0x8   :  { %152 = dma.done.wait [#allocation3], 32  }
   0x9   :  { %153 = vsyncadd [#allocation3], 4294967264 }
   0xa   :  { %154 = dma.done.wait [#allocation6], 64  }
   0xb   :  { %155 = vsyncadd [#allocation6], 4294967232  ;;  %v42_v0 = vld [vmem:[#allocation2] sm:$0x3]  ;;  %v43_v1 = vld [vmem:[#allocation5] sm:$0x3] }
   0xc   :  { %v47_v2 = vperm.slane %v42_v0, 0  ;;  %v46_v3 = vrot.slane %v42_v0, 1  ;;  %v44_v4 = vld [vmem:[#allocation5 + $0x2] sm:$0x3]  ;;  %s162_s0 = smov [#allocation7]   ;;  %s61_s23 = sshll.u32 %s189_s2, 4  ;;  %s62_s23 = int_to_ptr.hbm [resolvable:$true] %s61_s23 }
   0xd   :  { %s59_s21 = sshll.u32 %s162_s0, 4  ;;  %s60_s21 = int_to_ptr.vmem [resolvable:$true] %s59_s21 }
   0xe   :  { %v51_v5 = vmul.f32 %v47_v2, %v43_v1  ;;  %v48_v6 = vperm.slane %v46_v3, 0 }
  0x10   :  { %53 = vst [vmem:[#allocation7] sm:$0x3] %v51_v5  ;;  %v52_v7 = vmul.f32 %v48_v6, %v44_v4 }
  0x12   :  { %54 = vst [vmem:[#allocation7 + $0x2] sm:$0x3] %v52_v7 }
  0x13   :  { %67 = dma.vmem_to_hbm [thread:$0]  %s60_s21, 64, %s62_s23, [#allocation4], %s160_s19, %s160_s19, %s161_s20  }
  0x14   :  { %156 = dma.done.wait [#allocation4], 64  }
  0x15   :  { %157 = vsyncadd [#allocation4], 4294967232 }
  0x16   :  { %72 = vsyncpa [#allocation3], 1 }
  0x17   :  { %73 = vsyncpa [#allocation6], 1 }
  0x18   :  { %74 = vsyncpa [#allocation4], 1 }

</bundles_post_ra>
